<compile_context>
chip_gen: v7x
topology: tpu7x:2x2x1
jax: 0.10.0
libtpu: 0.0.40
codegen_flags: <defaults>
</compile_context>

<pallas_src>
import functools

import jax
import jax.numpy as jnp
from jax.experimental import pallas as pl
from jax.experimental.pallas import tpu as pltpu


def _round_up(x: int, m: int) -> int:
    return ((x + m - 1) // m) * m


def _cdiv(a: int, b: int) -> int:
    return -(-a // b)


def _largest_aligned_divisor(total: int, target: int, align: int = 128) -> int:
    """Largest multiple of `align` that divides `total` and is <= target."""
    n = total // align
    t = max(min(target // align, n), 1)
    for d in range(t, 0, -1):
        if n % d == 0:
            return d * align
    return align


def _vmem_capacity_bytes() -> int:
    try:
        return int(pltpu.get_tpu_info().vmem_capacity_bytes)
    except Exception:
        return 64 << 20  # v7x-safe fallback


def _resident_kernel(x_ref, w_ref, b_ref, o_ref, *, compute_dtype):
    # x_ref: (tm, Hp) input dtype; w_ref: (Hp, Hop) compute dtype (resident);
    # b_ref: (1, Hop) f32; o_ref: (tm, Hop) out dtype.
    acc = jnp.dot(x_ref[...].astype(compute_dtype), w_ref[...],
                  preferred_element_type=jnp.float32)
    o_ref[...] = (acc + b_ref[...]).astype(o_ref.dtype)


def _tiled_kernel(x_ref, w_ref, b_ref, o_ref, acc_ref, *, compute_dtype):
    # grid = (rows, out-cols, k); reduction axis (k) last.
    k = pl.program_id(2)

    @pl.when(k == 0)
    def _():
        acc_ref[...] = jnp.zeros_like(acc_ref)

    acc_ref[...] += jnp.dot(x_ref[...].astype(compute_dtype), w_ref[...],
                            preferred_element_type=jnp.float32)

    @pl.when(k == pl.num_programs(2) - 1)
    def _():
        o_ref[...] = (acc_ref[...] + b_ref[...]).astype(o_ref.dtype)


def sequence_wise_linear(x, w, b, *, tm=512, tk=1024, tn=2048,
                         compute_dtype=jnp.bfloat16, out_dtype=None,
                         force_tiled=False):
    """SequenceWise(nn.Linear) forward.

    x: (T, N, H)
    w: (H, H_out)   -- (in, out) layout, i.e. transpose of PyTorch's (out, in)
    b: (H_out,)
    returns: (T, N, H_out) in `out_dtype` (defaults to x.dtype); f32
    accumulation inside the kernel.
    """
    T, N, H = x.shape
    H_out = w.shape[1]
    M = T * N
    out_dtype = x.dtype if out_dtype is None else out_dtype

    x_item = jnp.dtype(x.dtype).itemsize
    comp_item = jnp.dtype(compute_dtype).itemsize
    out_item = jnp.dtype(out_dtype).itemsize
    vmem_cap = _vmem_capacity_bytes()

    # ---- lane-dense geometry ------------------------------------------------
    Hp = _round_up(H, 128)                               # padded K
    lane_out = 256 if H_out > 128 else 128               # feed 256-wide MXU
    Hop = _round_up(H_out, lane_out)                     # padded output width

    row_align = 16 if comp_item < 4 else 8               # packed-dtype sublanes
    tm_eff = _round_up(min(tm, _round_up(M, row_align)), row_align)
    # v7x has 2 TensorCores sharing the "parallel" row axis: keep >= 2 row
    # tiles when there is enough work to be worth splitting.
    if _cdiv(M, tm_eff) == 1 and M >= 256:
        tm_eff = _round_up(_cdiv(M, 2), row_align)
    Mp = _round_up(M, tm_eff)

    # ---- wrapper-side padding (x keeps its dtype; cast happens in-kernel) ---
    x2d = x.reshape(M, H)
    if Mp != M or Hp != H:
        x2d = jnp.pad(x2d, ((0, Mp - M), (0, Hp - H)))
    w_p = w
    if Hp != H or Hop != H_out:
        w_p = jnp.pad(w_p, ((0, Hp - H), (0, Hop - H_out)))
    w_p = w_p.astype(compute_dtype)
    b_p = jnp.pad(b.astype(jnp.float32), (0, Hop - H_out)).reshape(1, Hop)

    # ---- weight-resident fast path decision ---------------------------------
    weight_bytes = Hp * Hop * comp_item
    resident_footprint = (2 * tm_eff * Hp * x_item        # x double buffer
                          + 2 * weight_bytes              # weight (conservative)
                          + 2 * Hop * 4                   # bias
                          + 2 * tm_eff * Hop * out_item)  # output double buffer
    use_resident = (not force_tiled
                    and weight_bytes <= (16 << 20)
                    and resident_footprint <= int(0.6 * vmem_cap))

    if use_resident:
        grid = (Mp // tm_eff,)
        vmem_limit = int(min(max(resident_footprint + (4 << 20), 16 << 20),
                             int(0.85 * vmem_cap)))
        cost = pl.CostEstimate(
            flops=2 * Mp * Hp * Hop,
            transcendentals=0,
            bytes_accessed=(Mp * Hp * x_item          # x read once
                            + Hp * Hop * comp_item    # weight read once
                            + Hop * 4                 # bias
                            + Mp * Hop * out_item))   # output written once
        out2d = pl.pallas_call(
            functools.partial(_resident_kernel, compute_dtype=compute_dtype),
            out_shape=jax.ShapeDtypeStruct((Mp, Hop), out_dtype),
            grid_spec=pltpu.PrefetchScalarGridSpec(
                num_scalar_prefetch=0,
                grid=grid,
                in_specs=[
                    pl.BlockSpec((tm_eff, Hp), lambda i: (i, 0)),   # x rows
                    pl.BlockSpec((Hp, Hop), lambda i: (0, 0)),      # weight
                    pl.BlockSpec((1, Hop), lambda i: (0, 0)),       # bias
                ],
                out_specs=pl.BlockSpec((tm_eff, Hop), lambda i: (i, 0)),
            ),
            compiler_params=pltpu.CompilerParams(
                dimension_semantics=("parallel",),
                vmem_limit_bytes=vmem_limit),
            cost_estimate=cost,
        )(x2d, w_p, b_p)
    else:
        # ---- general K/N-tiled path ----------------------------------------
        tk_eff = _largest_aligned_divisor(Hp, tk, 128)    # no zero-K padding
        tn_eff = _largest_aligned_divisor(Hop, tn, 128)

        budget = int(0.7 * vmem_cap)
        while True:
            footprint = (2 * tm_eff * tk_eff * x_item
                         + 2 * tk_eff * tn_eff * comp_item
                         + 2 * tn_eff * 4
                         + 2 * tm_eff * tn_eff * out_item
                         + tm_eff * tn_eff * 4)           # f32 accumulator
            if footprint <= budget:
                break
            if tn_eff > 256:
                tn_eff = _largest_aligned_divisor(Hop, tn_eff // 2, 128)
            elif tk_eff > 128:
                tk_eff = _largest_aligned_divisor(Hp, tk_eff // 2, 128)
            elif tm_eff > row_align:
                tm_eff = _round_up(max(tm_eff // 2, row_align), row_align)
                Mp = _round_up(M, tm_eff)
            else:
                break

        grid = (Mp // tm_eff, Hop // tn_eff, Hp // tk_eff)
        n_row_tiles = grid[0]
        vmem_limit = int(min(max(footprint + (4 << 20), 16 << 20),
                             int(0.85 * vmem_cap)))
        cost = pl.CostEstimate(
            flops=2 * Mp * Hp * Hop,
            transcendentals=0,
            bytes_accessed=(Mp * Hp * x_item
                            + n_row_tiles * Hp * Hop * comp_item  # w re-reads
                            + Hop * 4
                            + Mp * Hop * out_item))
        out2d = pl.pallas_call(
            functools.partial(_tiled_kernel, compute_dtype=compute_dtype),
            out_shape=jax.ShapeDtypeStruct((Mp, Hop), out_dtype),
            grid_spec=pltpu.PrefetchScalarGridSpec(
                num_scalar_prefetch=0,
                grid=grid,
                in_specs=[
                    pl.BlockSpec((tm_eff, tk_eff), lambda i, j, k: (i, k)),
                    pl.BlockSpec((tk_eff, tn_eff), lambda i, j, k: (k, j)),
                    pl.BlockSpec((1, tn_eff), lambda i, j, k: (0, j)),
                ],
                out_specs=pl.BlockSpec((tm_eff, tn_eff),
                                       lambda i, j, k: (i, j)),
                scratch_shapes=[pltpu.VMEM((tm_eff, tn_eff), jnp.float32)],
            ),
            compiler_params=pltpu.CompilerParams(
                dimension_semantics=("parallel", "parallel", "arbitrary"),
                vmem_limit_bytes=vmem_limit),
            cost_estimate=cost,
        )(x2d, w_p, b_p)

    return out2d[:M, :H_out].reshape(T, N, H_out)


if __name__ == "__main__":
    key = jax.random.PRNGKey(0)
    key1, key2 = jax.random.split(key)

    def make_case(k, T, N, H, H_out):
        kx, kw, kb = jax.random.split(k, 3)
        x = jax.random.normal(kx, (T, N, H), dtype=jnp.float32)
        bound = 1.0 / jnp.sqrt(jnp.float32(H))
        w = jax.random.uniform(kw, (H, H_out), jnp.float32, -bound, bound)
        b = jax.random.uniform(kb, (H_out,), jnp.float32, -bound, bound)
        ref = (x.reshape(T * N, H) @ w + b).reshape(T, N, H_out)
        return x, w, b, ref

    # Case 1: SequenceWise(nn.Linear(32, 32)) on (T=8, N=2) input.
    # Exercises the weight-resident fast path and lane-padding to 128.
    T, N, H, H_out = 8, 2, 32, 32
    x, w, b, ref = make_case(key1, T, N, H, H_out)

    out_f32 = jax.block_until_ready(
        sequence_wise_linear(x, w, b, compute_dtype=jnp.float32))
    assert out_f32.shape == (T, N, H_out)
    assert jnp.allclose(out_f32, ref, atol=1e-5, rtol=1e-5)

    out_bf16 = jax.block_until_ready(
        sequence_wise_linear(x, w, b, compute_dtype=jnp.bfloat16))
    assert out_bf16.shape == (T, N, H_out)
    assert jnp.allclose(out_bf16, ref, atol=5e-2, rtol=5e-2)

    # Case 2: force the general K/N-tiled path (multi-k, multi-j grid) with
    # misaligned H / H_out to exercise divisor-based tiling + padding.
    T2, N2, H2, H_out2 = 8, 2, 320, 192
    x2, w2, b2, ref2 = make_case(key2, T2, N2, H2, H_out2)

    out_tiled = jax.block_until_ready(
        sequence_wise_linear(x2, w2, b2, tk=128, tn=128,
                             compute_dtype=jnp.float32, force_tiled=True))
    assert out_tiled.shape == (T2, N2, H_out2)
    assert jnp.allclose(out_tiled, ref2, atol=1e-4, rtol=1e-4)

    print("KERNEL_OK")
</pallas_src>

<mosaic_0001>
module attributes {stable_mosaic.version = 11 : i64} {
  func.func @_resident_kernel(%arg0: i32, %arg1: memref<16x128xf32, #tpu.memory_space<vmem>>, %arg2: memref<128x128xf32, #tpu.memory_space<vmem>>, %arg3: memref<1x128xf32, #tpu.memory_space<vmem>>, %arg4: memref<16x128xf32, #tpu.memory_space<vmem>>) attributes {dimension_semantics = [#tpu.dimension_semantics<parallel>], iteration_bounds = array<i64: 1>, scalar_prefetch = 0 : i64, scratch_operands = 0 : i64, tpu.core_type = #tpu.core_type<tc>, window_params = [{transform_indices = @transform_0, window_bounds = array<i64: 16, 128>}, {pipeline_mode = #tpu.pipeline_mode<synchronous>, transform_indices = @transform_1, window_bounds = array<i64: 128, 128>}, {pipeline_mode = #tpu.pipeline_mode<synchronous>, transform_indices = @transform_2, window_bounds = array<i64: 1, 128>}, {transform_indices = @transform_3, window_bounds = array<i64: 16, 128>}]} {
    %c0 = arith.constant 0 : index
    %c0_0 = arith.constant 0 : index
    %0 = vector.load %arg1[%c0, %c0_0] : memref<16x128xf32, #tpu.memory_space<vmem>>, vector<16x128xf32>
    %c0_1 = arith.constant 0 : index
    %c0_2 = arith.constant 0 : index
    %1 = vector.load %arg2[%c0_1, %c0_2] : memref<128x128xf32, #tpu.memory_space<vmem>>, vector<128x128xf32>
    %cst = arith.constant dense<0.000000e+00> : vector<16x128xf32>
    %2 = tpu.matmul %0, %1, %cst {dimension_numbers = #tpu.dot_dimension_numbers<[1], [0], [0], [1], [0, 0, 1, 1], [], []>} : vector<16x128xf32>, vector<128x128xf32>, vector<16x128xf32> -> vector<16x128xf32>
    %c0_3 = arith.constant 0 : index
    %c0_4 = arith.constant 0 : index
    %3 = vector.load %arg3[%c0_3, %c0_4] : memref<1x128xf32, #tpu.memory_space<vmem>>, vector<1x128xf32>
    %4 = vector.broadcast %3 : vector<1x128xf32> to vector<16x128xf32>
    %5 = arith.addf %2, %4 : vector<16x128xf32>
    %c0_5 = arith.constant 0 : index
    %c0_6 = arith.constant 0 : index
    %6 = vector.load %arg4[%c0_5, %c0_6] : memref<16x128xf32, #tpu.memory_space<vmem>>, vector<16x128xf32>
    tpu.vector_store %arg4[%c0_5, %c0_6], %5 {strides = array<i32>} : memref<16x128xf32, #tpu.memory_space<vmem>>, vector<16x128xf32>,
    return
  }
  func.func @transform_0(%arg0: i32) -> (i32, i32) {
    %c0_i32 = arith.constant 0 : i32
    %c0_i32_0 = arith.constant 0 : i32
    return %arg0, %c0_i32 : i32, i32
  }
  func.func @transform_1(%arg0: i32) -> (i32, i32) {
    %c0_i32 = arith.constant 0 : i32
    %c0_i32_0 = arith.constant 0 : i32
    %c0_i32_1 = arith.constant 0 : i32
    return %c0_i32, %c0_i32_0 : i32, i32
  }
  func.func @transform_2(%arg0: i32) -> (i32, i32) {
    %c0_i32 = arith.constant 0 : i32
    %c0_i32_0 = arith.constant 0 : i32
    %c0_i32_1 = arith.constant 0 : i32
    return %c0_i32, %c0_i32_0 : i32, i32
  }
  func.func @transform_3(%arg0: i32) -> (i32, i32) {
    %c0_i32 = arith.constant 0 : i32
    %c0_i32_0 = arith.constant 0 : i32
    return %arg0, %c0_i32 : i32, i32
  }
}

</mosaic_0001>

<bundles_post_ra>
// kernel: tpu_custom_call.1
= control target key start
LH: loop header
LB: loop body
LE: loop exit
PB: predicated region body
PF: predicated region fallthrough
CT: control target
= control target key end

     0   :  { %8 = vsyncpa [#allocation3], 0  ;;  %s399_s0 = inlined_call_operand.hbm [shape: f32[16,128], index: 0, kind: input, shape index: {}]   ;;  %s400_s1 = inlined_call_operand.hbm [shape: f32[128,128], index: 1, kind: input, shape index: {}]   ;;  %s401_s2 = inlined_call_operand.vmem [shape: f32[1,128], index: 2, kind: input, shape index: {}]   ;;  %s402_s3 = inlined_call_operand.hbm [shape: f32[16,128], index: 3, kind: output, shape index: {}]  }
   0x1   :  { %9 = vsyncpa [#allocation6], 0 }
   0x2   :  { %10 = vsyncpa [#allocation4], 0  ;;  %s326_s12 = smov [#allocation2]   ;;  %s254_s16 = scalar_lea.hbm %s399_s0, 256 }
   0x3   :  { %s16_s13 = sshll.u32 %s326_s12, 4  ;;  %p255_p0 = scmp.ne.s32.totalorder %s399_s0, %s254_s16  ;;  %s17_s13 = int_to_ptr.vmem [resolvable:$true] %s16_s13 }
   0x4   :  { %p258_p1 = scmp.lt.u32.totalorder %s254_s16, %s399_s0 }
   0x6   :  { %p260_p2 = pnand %p258_p1, %p255_p0 }
   0x8   :  { %263 = shalt.err (!%p260_p2)
}
   0x9   :  { %s264_s21 = scalar_lea.vmem %s17_s13, 256  ;;  %p269_p4 = scmp.lt.s32.totalorder %s17_s13, %s17_s13 }
   0xa   :  { %p265_p3 = scmp.ne.s32.totalorder %s17_s13, %s264_s21  ;;  %p270_p5 = scmp.lt.s32.totalorder %s264_s21, %s264_s21 }
   0xc   :  { %p271_p6 = por %p270_p5, %p269_p4 }
   0xe   :  { %p272_p7 = pnand %p271_p6, %p265_p3 }
  0x10   :  { %275 = shalt.err (!%p272_p7)
}
  0x11   :  { %s327_s22 = smov 128   ;;  %s328_s23 = smov 8  }
  0x12   :  { %22 = dma.hbm_to_vmem [thread:$0]  %s399_s0, 256, %s17_s13, [#allocation3], %s327_s22, %s327_s22, %s328_s23  }
  0x13   :  { %s329_s26 = smov [#allocation5]   ;;  %s276_s30 = scalar_lea.hbm %s400_s1, 2048 }
  0x14   :  { %s28_s27 = sshll.u32 %s329_s26, 4  ;;  %p277_p8 = scmp.ne.s32.totalorder %s400_s1, %s276_s30  ;;  %s29_s27 = int_to_ptr.vmem [resolvable:$true] %s28_s27 }
  0x15   :  { %p280_p9 = scmp.lt.u32.totalorder %s276_s30, %s400_s1 }
  0x17   :  { %p282_p10 = pnand %p280_p9, %p277_p8 }
  0x19   :  { %285 = shalt.err (!%p282_p10)
}
  0x1a   :  { %s286_s8 = scalar_lea.vmem %s29_s27, 2048  ;;  %p291_p12 = scmp.lt.s32.totalorder %s29_s27, %s29_s27 }
  0x1b   :  { %p287_p11 = scmp.ne.s32.totalorder %s29_s27, %s286_s8  ;;  %p292_p13 = scmp.lt.s32.totalorder %s286_s8, %s286_s8 }
  0x1d   :  { %p293_p0 = por %p292_p13, %p291_p12 }
  0x1f   :  { %p294_p1 = pnand %p293_p0, %p287_p11 }
  0x21   :  { %297 = shalt.err (!%p294_p1)
}
  0x22   :  { %34 = dma.hbm_to_vmem [thread:$0]  %s400_s1, 2048, %s29_s27, [#allocation6], %s327_s22, %s327_s22, %s328_s23  }
  0x23   :  { %320 = dma.done.wait [#allocation3], 256  }
  0x24   :  { %321 = vsyncadd [#allocation3], 4294967040 }
  0x25   :  { %322 = dma.done.wait [#allocation6], 2048  }
  0x26   :  { %323 = vsyncadd [#allocation6], 4294965248  ;;  %v45_v0 = vld [vmem:[#allocation5] sm:$0xff]  ;;  %v46_v1 = vld [vmem:[#allocation5 + $0x8] sm:$0xff]  ;;  %s330_s11 = smov [#allocation7]  }
  0x27   :  { %v47_v2 = vld [vmem:[#allocation5 + $0x10] sm:$0xff]  ;;  %v217_v3 = vpack.c.bf16 %v46_v1, %v45_v0  ;;  %v48_v4 = vld [vmem:[#allocation5 + $0x18] sm:$0xff]  ;;  %v49_v6 = vld [vmem:[#allocation5 + $0x20] sm:$0xff]  ;;  %s150_s12 = sshll.u32 %s330_s11, 4  ;;  %s151_s12 = int_to_ptr.vmem [resolvable:$true] %s150_s12 }
  0x28   :  { %v221_v5 = vpack.c.bf16 %v48_v4, %v47_v2  ;;  %v50_v7 = vld [vmem:[#allocation5 + $0x28] sm:$0xff]  ;;  %v43_v9 = vld [vmem:[#allocation2] sm:$0xff]  ;;  %v52_v11 = vld [vmem:[#allocation5 + $0x38] sm:$0xff]  ;;  %s298_s13 = scalar_lea.vmem %s151_s12, 256  ;;  %p303_p3 = scmp.lt.s32.totalorder %s151_s12, %s151_s12 }
  0x29   :  { %218 = vmatprep.subr.bf16.mxu0 %v217_v3  ;;  %v225_v8 = vpack.c.bf16 %v50_v7, %v49_v6  ;;  %v51_v10 = vld [vmem:[#allocation5 + $0x30] sm:$0xff]  ;;  %214 = vmatprep.mubr.f32.mxu0 %v43_v9  ;;  %v53_v13 = vld [vmem:[#allocation5 + $0x40] sm:$0xff]  ;;  %v54_v14 = vld [vmem:[#allocation5 + $0x48] sm:$0xff]  ;;  %p299_p2 = scmp.ne.s32.totalorder %s151_s12, %s298_s13  ;;  %p304_p4 = scmp.lt.s32.totalorder %s298_s13, %s298_s13 }
  0x2a   :  { %220 = vmatpush3.bf16.msra.mxu0 %v217_v3  ;;  %v229_v12 = vpack.c.bf16 %v52_v11, %v51_v10  ;;  %v233_v15 = vpack.c.bf16 %v54_v14, %v53_v13  ;;  %v55_v16 = vld [vmem:[#allocation5 + $0x50] sm:$0xff]  ;;  %v56_v17 = vld [vmem:[#allocation5 + $0x58] sm:$0xff]  ;;  %v57_v19 = vld [vmem:[#allocation5 + $0x60] sm:$0xff] }
  0x2b   :  { %222 = vmatprep.subr.bf16.mxu0 %v221_v5  ;;  %v237_v18 = vpack.c.bf16 %v56_v17, %v55_v16  ;;  %v58_v20 = vld [vmem:[#allocation5 + $0x68] sm:$0xff]  ;;  %v59_v22 = vld [vmem:[#allocation5 + $0x70] sm:$0xff]  ;;  %v60_v23 = vld [vmem:[#allocation5 + $0x78] sm:$0xff]  ;;  %p305_p5 = por %p304_p4, %p303_p3 }
  0x2c   :  { %v241_v21 = vpack.c.bf16 %v58_v20, %v57_v19  ;;  %v245_v24 = vpack.c.bf16 %v60_v23, %v59_v22  ;;  %v44_v25 = vld [vmem:[#allocation2 + $0x8] sm:$0xff]  ;;  %v163_v26 = vld [vmem:[%s401_s2] ss:$0 sm:$0xff] }
  0x2d   :  { %p306_p6 = pnand %p305_p5, %p299_p2 }
  0x2e   :  { %224 = vmatpush3.bf16.msra.mxu0 %v221_v5 }
  0x2f   :  { %226 = vmatprep.subr.bf16.mxu0 %v225_v8 }
  0x32   :  { %228 = vmatpush3.bf16.msra.mxu0 %v225_v8 }
  0x33   :  { %230 = vmatprep.subr.bf16.mxu0 %v229_v12 }
  0x36   :  { %232 = vmatpush3.bf16.msra.mxu0 %v229_v12 }
  0x37   :  { %234 = vmatprep.subr.bf16.mxu0 %v233_v15 }
  0x3a   :  { %236 = vmatpush3.bf16.msra.mxu0 %v233_v15 }
  0x3b   :  { %238 = vmatprep.subr.bf16.mxu0 %v237_v18 }
  0x3e   :  { %240 = vmatpush3.bf16.msra.mxu0 %v237_v18 }
  0x3f   :  { %242 = vmatprep.subr.bf16.mxu0 %v241_v21 }
  0x42   :  { %244 = vmatpush3.bf16.msra.mxu0 %v241_v21 }
  0x43   :  { %246 = vmatprep.subr.bf16.mxu0 %v245_v24 }
  0x46   :  { %248 = vmatpush3.bf16.msra.mxu0 %v245_v24 }
  0x49   :  { %215 = vmatmul.mubr.f32.vlgmr.msra.gmra.mrb[0].mxu0 %v44_v25 }
 0x11c   :  { %v216_v27 = vpop.f32.mrb[0].mxu0 }
 0x11d   :  { %v140_v28 = vadd.f32 %v216_v27, %v163_v26  ;;  %v134_v29 = vpop.f32.mrb[1].mxu0 }
 0x11e   :  { %v135_v30 = vadd.f32 %v163_v26, %v134_v29 }
 0x11f   :  { %144 = vst [vmem:[#allocation7 + $0x8] sm:$0xff] %v140_v28 }
 0x120   :  { %143 = vst [vmem:[#allocation7] sm:$0xff] %v135_v30 }
 0x121   :  { %309 = shalt.err (!%p306_p6)
}
 0x122   :  { %s310_s2 = scalar_lea.hbm %s402_s3, 256 }
 0x123   :  { %p311_p7 = scmp.ne.s32.totalorder %s402_s3, %s310_s2  ;;  %p314_p8 = scmp.lt.u32.totalorder %s310_s2, %s402_s3 }
 0x125   :  { %p316_p9 = pnand %p314_p8, %p311_p7 }
 0x127   :  { %319 = shalt.err (!%p316_p9)
}
 0x128   :  { %156 = dma.vmem_to_hbm [thread:$0]  %s151_s12, 256, %s402_s3, [#allocation4], %s327_s22, %s327_s22, %s328_s23  }
 0x129   :  { %324 = dma.done.wait [#allocation4], 256  }
 0x12a   :  { %325 = vsyncadd [#allocation4], 4294967040 }
 0x12b   :  { %160 = vsyncpa [#allocation3], 1 }
 0x12c   :  { %161 = vsyncpa [#allocation6], 1 }
 0x12d   :  { %162 = vsyncpa [#allocation4], 1 }

</bundles_post_ra>
